<compile_context>
chip_gen: v6e
topology: v6e:2x2x1
jax: 0.10.0
libtpu: 0.0.40
codegen_flags: <defaults>
</compile_context>

<pallas_src>
import functools

import jax
import jax.numpy as jnp
import numpy as np
from jax import lax
from jax.experimental import pallas as pl
from jax.experimental.pallas import tpu as pltpu


# -------------------------- Pallas kernel (hot path) -------------------------- #
def _dice_ce_kernel(x_ref, t_ref,                       # (1, C, T) native dtype, (1, 1, T) int
                    stats_ref, scal_ref,                # (1, C, 3) f32, (1, 1, 4) f32
                    tp_acc, pred_acc, gt_acc,           # VMEM scratch: (C, 1) f32
                    ce1_acc, ce2_acc, mk1_acc, mk2_acc, # VMEM scratch: (1, 1) f32
                    *, n_valid, tail):
    s = pl.program_id(1)
    n_s = pl.num_programs(1)
    C, T = x_ref.shape[1], x_ref.shape[2]

    @pl.when(s == 0)
    def _():
        tp_acc[...] = jnp.zeros_like(tp_acc)
        pred_acc[...] = jnp.zeros_like(pred_acc)
        gt_acc[...] = jnp.zeros_like(gt_acc)
        ce1_acc[...] = jnp.zeros_like(ce1_acc)
        ce2_acc[...] = jnp.zeros_like(ce2_acc)
        mk1_acc[...] = jnp.zeros_like(mk1_acc)
        mk2_acc[...] = jnp.zeros_like(mk2_acc)

    # Cast per-tile (inputs stream in their native dtype, e.g. bf16 logits).
    x = x_ref[0].astype(jnp.float32)                    # (C, T)
    t = t_ref[0].astype(jnp.int32)                      # (1, T)

    if tail:
        pos = s * T + lax.broadcasted_iota(jnp.int32, (1, T), 1)
        valid = pos < n_valid                           # (1, T) bool
        x = jnp.where(valid, x, 0.0)                    # keep exp() finite on pad lanes

    # softmax over the channel (sublane) axis; m / log(sum_exp) shared with CE
    m = jnp.max(x, axis=0, keepdims=True)               # (1, T)
    e = jnp.exp(x - m)                                  # (C, T)
    ssum = jnp.sum(e, axis=0, keepdims=True)            # (1, T)
    inv_s = pl.reciprocal(ssum, approx=False)           # EUP instead of VALU divide
    sm = e * inv_s                                      # (C, T)
    log_s = jnp.log(ssum)                               # (1, T)

    cls = lax.broadcasted_iota(jnp.int32, (C, T), 0)
    sel = cls == t                                      # (C, T) bool, no f32 onehot temp
    if tail:
        sel = jnp.logical_and(sel, valid)
        smv = jnp.where(valid, sm, 0.0)
    else:
        smv = sm

    # per-channel spatial partial sums; fp/fn derived by difference in the wrapper
    tp_acc[...] += jnp.sum(jnp.where(sel, sm, 0.0), axis=1, keepdims=True)
    pred_acc[...] += jnp.sum(smv, axis=1, keepdims=True)
    gt_acc[...] += jnp.sum(jnp.where(sel, 1.0, 0.0), axis=1, keepdims=True)

    # CE without materializing log_softmax: -log_softmax[target] = log(s) + m - x_t
    x_t = jnp.sum(jnp.where(sel, x, 0.0), axis=0, keepdims=True)   # (1, T)
    ce_pix = (log_s + m) - x_t                                     # (1, T)

    # Both candidate ignore labels accumulated (fused label statistics).
    m1 = t != 1
    m2 = t != 2
    if tail:
        m1 = jnp.logical_and(m1, valid)
        m2 = jnp.logical_and(m2, valid)
    m1f = m1.astype(jnp.float32)
    m2f = m2.astype(jnp.float32)
    ce1_acc[...] += jnp.sum(ce_pix * m1f).reshape(1, 1)
    ce2_acc[...] += jnp.sum(ce_pix * m2f).reshape(1, 1)
    mk1_acc[...] += jnp.sum(m1f).reshape(1, 1)
    mk2_acc[...] += jnp.sum(m2f).reshape(1, 1)

    @pl.when(s == n_s - 1)
    def _():
        stats_ref[0, :, 0:1] = tp_acc[...]
        stats_ref[0, :, 1:2] = pred_acc[...]
        stats_ref[0, :, 2:3] = gt_acc[...]
        scal_ref[0, :, 0:1] = ce1_acc[...]
        scal_ref[0, :, 1:2] = ce2_acc[...]
        scal_ref[0, :, 2:3] = mk1_acc[...]
        scal_ref[0, :, 3:4] = mk2_acc[...]


# ------------------------------ tile selection ------------------------------ #
def _round_up(v, m):
    return ((v + m - 1) // m) * m


def _choose_spatial_tile(N, C, x_itemsize, t_itemsize, vmem_cap):
    """Bandwidth-friendly tile: ~2 MiB logits block, bounded by a VMEM budget."""
    budget = min(48 << 20, int(vmem_cap * 0.6))
    # double-buffered input blocks + ~8 f32 (C, TILE) compiler temps
    per_lane = 2 * (C * x_itemsize + t_itemsize) + 8 * C * 4
    tile = min((2 << 20) // max(1, C * x_itemsize), budget // per_lane)
    tile = max(128, (tile // 128) * 128)
    return min(tile, _round_up(N, 128))


# ------------------------------ wrapper (glue) ------------------------------ #
@functools.partial(jax.jit, static_argnames=("batch_dice", "do_bg", "log_dice"))
def dc_and_ce_loss_masked(net_output, target, *,
                          batch_dice=True, smooth=1e-5, do_bg=False,
                          weight_ce=1.0, weight_dice=1.0, log_dice=False):
    B, C, H, W = net_output.shape
    assert target.shape == (B, 1, H, W), "target must be (b, 1, x, y)"
    N = H * W

    # Lane-dense flatten of the spatial dims (free contiguous reshape, native dtypes).
    x = net_output.reshape(B, C, N)
    t = target.reshape(B, 1, N)

    try:
        vmem_cap = int(pltpu.get_tpu_info().vmem_capacity_bytes)
    except Exception:
        vmem_cap = 64 << 20          # conservative (v7x-sized) default

    x_isz = jnp.dtype(net_output.dtype).itemsize
    t_isz = jnp.dtype(target.dtype).itemsize
    TILE = _choose_spatial_tile(N, C, x_isz, t_isz, vmem_cap)
    n_s = pl.cdiv(N, TILE)
    tail = (N % TILE) != 0

    per_lane = 2 * (C * x_isz + t_isz) + 8 * C * 4
    working = per_lane * TILE + (1 << 20)
    vmem_limit = int(min(int(0.75 * vmem_cap), max(32 << 20, int(1.5 * working))))
    vmem_limit = max(vmem_limit, working)

    kernel = functools.partial(_dice_ce_kernel, n_valid=N, tail=tail)

    grid_spec = pltpu.PrefetchScalarGridSpec(
        num_scalar_prefetch=0,
        grid=(B, n_s),                                   # spatial (reduction) axis last
        in_specs=[
            pl.BlockSpec((1, C, TILE), lambda b, s: (b, 0, s)),
            pl.BlockSpec((1, 1, TILE), lambda b, s: (b, 0, s)),
        ],
        out_specs=[
            pl.BlockSpec((1, C, 3), lambda b, s: (b, 0, 0)),   # tp / sum(sm) / class hist
            pl.BlockSpec((1, 1, 4), lambda b, s: (b, 0, 0)),   # ce1 / ce2 / mk1 / mk2
        ],
        scratch_shapes=[
            pltpu.VMEM((C, 1), jnp.float32),   # tp
            pltpu.VMEM((C, 1), jnp.float32),   # pred (sum softmax)
            pltpu.VMEM((C, 1), jnp.float32),   # gt (class histogram)
            pltpu.VMEM((1, 1), jnp.float32),   # ce sum, ignore=1
            pltpu.VMEM((1, 1), jnp.float32),   # ce sum, ignore=2
            pltpu.VMEM((1, 1), jnp.float32),   # mask sum, ignore=1
            pltpu.VMEM((1, 1), jnp.float32),   # mask sum, ignore=2
        ],
    )
    out_shapes = (
        jax.ShapeDtypeStruct((B, C, 3), jnp.float32),
        jax.ShapeDtypeStruct((B, 1, 4), jnp.float32),
    )

    stats, scal = pl.pallas_call(
        kernel,
        grid_spec=grid_spec,
        out_shape=out_shapes,
        compiler_params=pltpu.CompilerParams(
            dimension_semantics=("parallel", "arbitrary"),
            vmem_limit_bytes=vmem_limit),
    )(x, t)

    # ------------------------- dice (SoftDiceLoss) ------------------------- #
    tp_b = stats[:, :, 0]
    fp_b = stats[:, :, 1] - tp_b       # sum(sm * (1 - onehot)) = sum(sm) - tp
    fn_b = stats[:, :, 2] - tp_b       # sum((1 - sm) * onehot) = hist - tp
    if batch_dice:
        tp, fp, fn = tp_b.sum(0), fp_b.sum(0), fn_b.sum(0)
    else:
        tp, fp, fn = tp_b, fp_b, fn_b

    nominator = 2.0 * tp + smooth
    denominator = 2.0 * tp + fp + fn + smooth
    dc = nominator / (denominator + 1e-8)
    if not do_bg:
        dc = dc[1:] if batch_dice else dc[:, 1:]
    dc_loss = -dc.mean()
    if log_dice:
        dc_loss = -jnp.log(-dc_loss)

    # --------------------- masked CE + ignore-label pick --------------------- #
    ce1 = jnp.sum(scal[:, 0, 0])
    ce2 = jnp.sum(scal[:, 0, 1])
    mk1 = jnp.sum(scal[:, 0, 2])       # count of (t != 1)
    mk2 = jnp.sum(scal[:, 0, 3])       # count of (t != 2)
    total = jnp.float32(B * N)
    cnt1 = total - mk1
    cnt2 = total - mk2
    # torch.unique(..., return_counts=True) based ignore-label selection
    ignore_is_1 = jnp.where(cnt1 == 0, True,
                            jnp.where(cnt2 == 0, False, cnt1 > cnt2))
    ce_loss = jnp.where(ignore_is_1, ce1 / mk1, ce2 / mk2)

    return weight_ce * ce_loss + weight_dice * dc_loss


# --------------------------- pure-JAX reference --------------------------- #
def _reference_loss(net_output, target, *, batch_dice=True, smooth=1e-5, do_bg=False,
                    weight_ce=1.0, weight_dice=1.0):
    B, C, H, W = net_output.shape
    net_output = net_output.astype(jnp.float32)
    t = target[:, 0].astype(jnp.int32)
    sm = jax.nn.softmax(net_output, axis=1)
    log_sm = jax.nn.log_softmax(net_output, axis=1)
    onehot = jnp.transpose(jax.nn.one_hot(t, C, dtype=jnp.float32), (0, 3, 1, 2))
    axes = (0, 2, 3) if batch_dice else (2, 3)
    tp = jnp.sum(sm * onehot, axis=axes)
    fp = jnp.sum(sm * (1.0 - onehot), axis=axes)
    fn = jnp.sum((1.0 - sm) * onehot, axis=axes)
    dc = (2 * tp + smooth) / (2 * tp + fp + fn + smooth + 1e-8)
    if not do_bg:
        dc = dc[1:] if batch_dice else dc[:, 1:]
    dc_loss = -dc.mean()
    ce_pix = -jnp.take_along_axis(log_sm, t[:, None], axis=1)[:, 0]
    cnt1 = jnp.sum(target == 1)
    cnt2 = jnp.sum(target == 2)
    ignore = jnp.where(cnt1 == 0, 1, jnp.where(cnt2 == 0, 2, jnp.where(cnt1 > cnt2, 1, 2)))
    mask = (t != ignore).astype(jnp.float32)
    ce_loss = jnp.sum(ce_pix * mask) / jnp.sum(mask)
    return weight_ce * ce_loss + weight_dice * dc_loss


if __name__ == "__main__":
    key = jax.random.PRNGKey(0)
    k1, k2 = jax.random.split(key)
    B, C, H, W = 2, 4, 16, 16
    net_output = jax.random.normal(k1, (B, C, H, W), dtype=jnp.float32)
    target = jax.random.randint(k2, (B, 1, H, W), 0, C, dtype=jnp.int32)

    loss = dc_and_ce_loss_masked(net_output, target)
    loss = jax.block_until_ready(loss)

    ref = jax.block_until_ready(_reference_loss(net_output, target))
    np.testing.assert_allclose(np.asarray(loss), np.asarray(ref), rtol=1e-5, atol=1e-5)

    print("KERNEL_OK")
</pallas_src>

<mosaic_0001>
module attributes {stable_mosaic.version = 11 : i64} {
  func.func @_dice_ce_kernel(%arg0: i32, %arg1: i32, %arg2: memref<1x4x256xf32, #tpu.memory_space<vmem>>, %arg3: memref<1x1x256xi32, #tpu.memory_space<vmem>>, %arg4: memref<1x4x3xf32, #tpu.memory_space<vmem>>, %arg5: memref<1x1x4xf32, #tpu.memory_space<vmem>>, %arg6: memref<4x1xf32, #tpu.memory_space<vmem>>, %arg7: memref<4x1xf32, #tpu.memory_space<vmem>>, %arg8: memref<4x1xf32, #tpu.memory_space<vmem>>, %arg9: memref<1x1xf32, #tpu.memory_space<vmem>>, %arg10: memref<1x1xf32, #tpu.memory_space<vmem>>, %arg11: memref<1x1xf32, #tpu.memory_space<vmem>>, %arg12: memref<1x1xf32, #tpu.memory_space<vmem>>) attributes {dimension_semantics = [#tpu.dimension_semantics<parallel>, #tpu.dimension_semantics<arbitrary>], iteration_bounds = array<i64: 2, 1>, scalar_prefetch = 0 : i64, scratch_operands = 7 : i64, tpu.core_type = #tpu.core_type<tc>, window_params = [{transform_indices = @transform_0, window_bounds = array<i64: 1, 4, 256>}, {transform_indices = @transform_1, window_bounds = array<i64: 1, 1, 256>}, {transform_indices = @transform_2, window_bounds = array<i64: 1, 4, 3>}, {transform_indices = @transform_3, window_bounds = array<i64: 1, 1, 4>}]} {
    %c0_i32 = arith.constant 0 : i32
    %0 = arith.cmpi eq, %arg1, %c0_i32 : i32
    %1 = arith.extui %0 : i1 to i32
    %c0_i32_0 = arith.constant 0 : i32
    %2 = arith.cmpi ne, %1, %c0_i32_0 : i32
    scf.if %2 {
      %cst_49 = arith.constant 0.000000e+00 : f32
      %92 = vector.broadcast %cst_49 : f32 to vector<4x1xf32>
      %c0_50 = arith.constant 0 : index
      %c0_51 = arith.constant 0 : index
      %93 = vector.load %arg6[%c0_50, %c0_51] : memref<4x1xf32, #tpu.memory_space<vmem>>, vector<4x1xf32>
      tpu.vector_store %arg6[%c0_50, %c0_51], %92 {strides = array<i32>} : memref<4x1xf32, #tpu.memory_space<vmem>>, vector<4x1xf32>,
      %cst_52 = arith.constant 0.000000e+00 : f32
      %94 = vector.broadcast %cst_52 : f32 to vector<4x1xf32>
      %c0_53 = arith.constant 0 : index
      %c0_54 = arith.constant 0 : index
      %95 = vector.load %arg7[%c0_53, %c0_54] : memref<4x1xf32, #tpu.memory_space<vmem>>, vector<4x1xf32>
      tpu.vector_store %arg7[%c0_53, %c0_54], %94 {strides = array<i32>} : memref<4x1xf32, #tpu.memory_space<vmem>>, vector<4x1xf32>,
      %cst_55 = arith.constant 0.000000e+00 : f32
      %96 = vector.broadcast %cst_55 : f32 to vector<4x1xf32>
      %c0_56 = arith.constant 0 : index
      %c0_57 = arith.constant 0 : index
      %97 = vector.load %arg8[%c0_56, %c0_57] : memref<4x1xf32, #tpu.memory_space<vmem>>, vector<4x1xf32>
      tpu.vector_store %arg8[%c0_56, %c0_57], %96 {strides = array<i32>} : memref<4x1xf32, #tpu.memory_space<vmem>>, vector<4x1xf32>,
      %cst_58 = arith.constant 0.000000e+00 : f32
      %98 = vector.broadcast %cst_58 : f32 to vector<1x1xf32>
      %c0_59 = arith.constant 0 : index
      %c0_60 = arith.constant 0 : index
      %99 = vector.load %arg9[%c0_59, %c0_60] : memref<1x1xf32, #tpu.memory_space<vmem>>, vector<1x1xf32>
      tpu.vector_store %arg9[%c0_59, %c0_60], %98 {strides = array<i32>} : memref<1x1xf32, #tpu.memory_space<vmem>>, vector<1x1xf32>,
      %cst_61 = arith.constant 0.000000e+00 : f32
      %100 = vector.broadcast %cst_61 : f32 to vector<1x1xf32>
      %c0_62 = arith.constant 0 : index
      %c0_63 = arith.constant 0 : index
      %101 = vector.load %arg10[%c0_62, %c0_63] : memref<1x1xf32, #tpu.memory_space<vmem>>, vector<1x1xf32>
      tpu.vector_store %arg10[%c0_62, %c0_63], %100 {strides = array<i32>} : memref<1x1xf32, #tpu.memory_space<vmem>>, vector<1x1xf32>,
      %cst_64 = arith.constant 0.000000e+00 : f32
      %102 = vector.broadcast %cst_64 : f32 to vector<1x1xf32>
      %c0_65 = arith.constant 0 : index
      %c0_66 = arith.constant 0 : index
      %103 = vector.load %arg11[%c0_65, %c0_66] : memref<1x1xf32, #tpu.memory_space<vmem>>, vector<1x1xf32>
      tpu.vector_store %arg11[%c0_65, %c0_66], %102 {strides = array<i32>} : memref<1x1xf32, #tpu.memory_space<vmem>>, vector<1x1xf32>,
      %cst_67 = arith.constant 0.000000e+00 : f32
      %104 = vector.broadcast %cst_67 : f32 to vector<1x1xf32>
      %c0_68 = arith.constant 0 : index
      %c0_69 = arith.constant 0 : index
      %105 = vector.load %arg12[%c0_68, %c0_69] : memref<1x1xf32, #tpu.memory_space<vmem>>, vector<1x1xf32>
      tpu.vector_store %arg12[%c0_68, %c0_69], %104 {strides = array<i32>} : memref<1x1xf32, #tpu.memory_space<vmem>>, vector<1x1xf32>,
    } else {
    }
    %c0 = arith.constant 0 : index
    %c0_1 = arith.constant 0 : index
    %c0_2 = arith.constant 0 : index
    %3 = vector.load %arg2[%c0, %c0_1, %c0_2] : memref<1x4x256xf32, #tpu.memory_space<vmem>>, vector<1x4x256xf32>
    %4 = vector.shape_cast %3 : vector<1x4x256xf32> to vector<4x256xf32>
    %c0_3 = arith.constant 0 : index
    %c0_4 = arith.constant 0 : index
    %c0_5 = arith.constant 0 : index
    %5 = vector.load %arg3[%c0_3, %c0_4, %c0_5] : memref<1x1x256xi32, #tpu.memory_space<vmem>>, vector<1x1x256xi32>
    %6 = vector.shape_cast %5 : vector<1x1x256xi32> to vector<1x256xi32>
    %cst = arith.constant dense<0xFF800000> : vector<256xf32>
    %7 = vector.multi_reduction <maximumf>, %4, %cst [0] : vector<4x256xf32> to vector<256xf32>
    %8 = vector.shape_cast %7 : vector<256xf32> to vector<1x256xf32>
    %9 = vector.broadcast %8 : vector<1x256xf32> to vector<4x256xf32>
    %10 = arith.subf %4, %9 : vector<4x256xf32>
    %11 = math.exp %10 : vector<4x256xf32>
    %cst_6 = arith.constant dense<0.000000e+00> : vector<256xf32>
    %12 = vector.multi_reduction <add>, %11, %cst_6 [0] : vector<4x256xf32> to vector<256xf32>
    %13 = vector.shape_cast %12 : vector<256xf32> to vector<1x256xf32>
    %14 = tpu.reciprocal %13 : vector<1x256xf32> -> vector<1x256xf32>
    %15 = vector.broadcast %14 : vector<1x256xf32> to vector<4x256xf32>
    %16 = arith.mulf %11, %15 : vector<4x256xf32>
    %17 = math.log %13 : vector<1x256xf32>
    %18 = tpu.iota {dimensions = array<i32: 0>} : vector<4x256xi32>
    %19 = vector.broadcast %6 : vector<1x256xi32> to vector<4x256xi32>
    %20 = arith.cmpi eq, %18, %19 : vector<4x256xi32>
    %c0_7 = arith.constant 0 : index
    %c0_8 = arith.constant 0 : index
    %21 = vector.load %arg6[%c0_7, %c0_8] : memref<4x1xf32, #tpu.memory_space<vmem>>, vector<4x1xf32>
    %cst_9 = arith.constant 0.000000e+00 : f32
    %22 = vector.broadcast %cst_9 : f32 to vector<4x256xf32>
    %23 = arith.select %20, %16, %22 : vector<4x256xi1>, vector<4x256xf32>
    %cst_10 = arith.constant dense<0.000000e+00> : vector<4xf32>
    %24 = vector.multi_reduction <add>, %23, %cst_10 [1] : vector<4x256xf32> to vector<4xf32>
    %25 = vector.shape_cast %24 : vector<4xf32> to vector<4x1xf32>
    %26 = arith.addf %21, %25 : vector<4x1xf32>
    %c0_11 = arith.constant 0 : index
    %c0_12 = arith.constant 0 : index
    %27 = vector.load %arg6[%c0_11, %c0_12] : memref<4x1xf32, #tpu.memory_space<vmem>>, vector<4x1xf32>
    tpu.vector_store %arg6[%c0_11, %c0_12], %26 {strides = array<i32>} : memref<4x1xf32, #tpu.memory_space<vmem>>, vector<4x1xf32>,
    %c0_13 = arith.constant 0 : index
    %c0_14 = arith.constant 0 : index
    %28 = vector.load %arg7[%c0_13, %c0_14] : memref<4x1xf32, #tpu.memory_space<vmem>>, vector<4x1xf32>
    %cst_15 = arith.constant dense<0.000000e+00> : vector<4xf32>
    %29 = vector.multi_reduction <add>, %16, %cst_15 [1] : vector<4x256xf32> to vector<4xf32>
    %30 = vector.shape_cast %29 : vector<4xf32> to vector<4x1xf32>
    %31 = arith.addf %28, %30 : vector<4x1xf32>
    %c0_16 = arith.constant 0 : index
    %c0_17 = arith.constant 0 : index
    %32 = vector.load %arg7[%c0_16, %c0_17] : memref<4x1xf32, #tpu.memory_space<vmem>>, vector<4x1xf32>
    tpu.vector_store %arg7[%c0_16, %c0_17], %31 {strides = array<i32>} : memref<4x1xf32, #tpu.memory_space<vmem>>, vector<4x1xf32>,
    %c0_18 = arith.constant 0 : index
    %c0_19 = arith.constant 0 : index
    %33 = vector.load %arg8[%c0_18, %c0_19] : memref<4x1xf32, #tpu.memory_space<vmem>>, vector<4x1xf32>
    %cst_20 = arith.constant 1.000000e+00 : f32
    %cst_21 = arith.constant 0.000000e+00 : f32
    %34 = vector.broadcast %cst_20 : f32 to vector<4x256xf32>
    %35 = vector.broadcast %cst_21 : f32 to vector<4x256xf32>
    %36 = arith.select %20, %34, %35 : vector<4x256xi1>, vector<4x256xf32>
    %cst_22 = arith.constant dense<0.000000e+00> : vector<4xf32>
    %37 = vector.multi_reduction <add>, %36, %cst_22 [1] : vector<4x256xf32> to vector<4xf32>
    %38 = vector.shape_cast %37 : vector<4xf32> to vector<4x1xf32>
    %39 = arith.addf %33, %38 : vector<4x1xf32>
    %c0_23 = arith.constant 0 : index
    %c0_24 = arith.constant 0 : index
    %40 = vector.load %arg8[%c0_23, %c0_24] : memref<4x1xf32, #tpu.memory_space<vmem>>, vector<4x1xf32>
    tpu.vector_store %arg8[%c0_23, %c0_24], %39 {strides = array<i32>} : memref<4x1xf32, #tpu.memory_space<vmem>>, vector<4x1xf32>,
    %cst_25 = arith.constant 0.000000e+00 : f32
    %41 = vector.broadcast %cst_25 : f32 to vector<4x256xf32>
    %42 = arith.select %20, %4, %41 : vector<4x256xi1>, vector<4x256xf32>
    %cst_26 = arith.constant dense<0.000000e+00> : vector<256xf32>
    %43 = vector.multi_reduction <add>, %42, %cst_26 [0] : vector<4x256xf32> to vector<256xf32>
    %44 = vector.shape_cast %43 : vector<256xf32> to vector<1x256xf32>
    %45 = arith.addf %17, %8 : vector<1x256xf32>
    %46 = arith.subf %45, %44 : vector<1x256xf32>
    %c1_i32 = arith.constant 1 : i32
    %47 = vector.broadcast %c1_i32 : i32 to vector<1x256xi32>
    %48 = arith.cmpi ne, %6, %47 : vector<1x256xi32>
    %c2_i32 = arith.constant 2 : i32
    %49 = vector.broadcast %c2_i32 : i32 to vector<1x256xi32>
    %50 = arith.cmpi ne, %6, %49 : vector<1x256xi32>
    %51 = arith.extui %48 : vector<1x256xi1> to vector<1x256xi32>
    %52 = arith.sitofp %51 : vector<1x256xi32> to vector<1x256xf32>
    %53 = arith.extui %50 : vector<1x256xi1> to vector<1x256xi32>
    %54 = arith.sitofp %53 : vector<1x256xi32> to vector<1x256xf32>
    %c0_27 = arith.constant 0 : index
    %c0_28 = arith.constant 0 : index
    %55 = vector.load %arg9[%c0_27, %c0_28] : memref<1x1xf32, #tpu.memory_space<vmem>>, vector<1x1xf32>
    %56 = arith.mulf %46, %52 : vector<1x256xf32>
    %57 = vector.shape_cast %56 : vector<1x256xf32> to vector<1x1x256xf32>
    %cst_29 = arith.constant dense<0.000000e+00> : vector<1xf32>
    %58 = vector.multi_reduction <add>, %57, %cst_29 [1, 2] : vector<1x1x256xf32> to vector<1xf32>
    %59 = vector.shape_cast %58 : vector<1xf32> to vector<1x1x1xf32>
    %60 = vector.extract %59[0, 0, 0] : f32 from vector<1x1x1xf32>
    %61 = vector.broadcast %60 : f32 to vector<1x1xf32>
    %62 = arith.addf %55, %61 : vector<1x1xf32>
    %c0_30 = arith.constant 0 : index
    %c0_31 = arith.constant 0 : index
    %63 = vector.load %arg9[%c0_30, %c0_31] : memref<1x1xf32, #tpu.memory_space<vmem>>, vector<1x1xf32>
    tpu.vector_store %arg9[%c0_30, %c0_31], %62 {strides = array<i32>} : memref<1x1xf32, #tpu.memory_space<vmem>>, vector<1x1xf32>,
    %c0_32 = arith.constant 0 : index
    %c0_33 = arith.constant 0 : index
    %64 = vector.load %arg10[%c0_32, %c0_33] : memref<1x1xf32, #tpu.memory_space<vmem>>, vector<1x1xf32>
    %65 = arith.mulf %46, %54 : vector<1x256xf32>
    %66 = vector.shape_cast %65 : vector<1x256xf32> to vector<1x1x256xf32>
    %cst_34 = arith.constant dense<0.000000e+00> : vector<1xf32>
    %67 = vector.multi_reduction <add>, %66, %cst_34 [1, 2] : vector<1x1x256xf32> to vector<1xf32>
    %68 = vector.shape_cast %67 : vector<1xf32> to vector<1x1x1xf32>
    %69 = vector.extract %68[0, 0, 0] : f32 from vector<1x1x1xf32>
    %70 = vector.broadcast %69 : f32 to vector<1x1xf32>
    %71 = arith.addf %64, %70 : vector<1x1xf32>
    %c0_35 = arith.constant 0 : index
    %c0_36 = arith.constant 0 : index
    %72 = vector.load %arg10[%c0_35, %c0_36] : memref<1x1xf32, #tpu.memory_space<vmem>>, vector<1x1xf32>
    tpu.vector_store %arg10[%c0_35, %c0_36], %71 {strides = array<i32>} : memref<1x1xf32, #tpu.memory_space<vmem>>, vector<1x1xf32>,
    %c0_37 = arith.constant 0 : index
    %c0_38 = arith.constant 0 : index
    %73 = vector.load %arg11[%c0_37, %c0_38] : memref<1x1xf32, #tpu.memory_space<vmem>>, vector<1x1xf32>
    %74 = vector.shape_cast %52 : vector<1x256xf32> to vector<1x1x256xf32>
    %cst_39 = arith.constant dense<0.000000e+00> : vector<1xf32>
    %75 = vector.multi_reduction <add>, %74, %cst_39 [1, 2] : vector<1x1x256xf32> to vector<1xf32>
    %76 = vector.shape_cast %75 : vector<1xf32> to vector<1x1x1xf32>
    %77 = vector.extract %76[0, 0, 0] : f32 from vector<1x1x1xf32>
    %78 = vector.broadcast %77 : f32 to vector<1x1xf32>
    %79 = arith.addf %73, %78 : vector<1x1xf32>
    %c0_40 = arith.constant 0 : index
    %c0_41 = arith.constant 0 : index
    %80 = vector.load %arg11[%c0_40, %c0_41] : memref<1x1xf32, #tpu.memory_space<vmem>>, vector<1x1xf32>
    tpu.vector_store %arg11[%c0_40, %c0_41], %79 {strides = array<i32>} : memref<1x1xf32, #tpu.memory_space<vmem>>, vector<1x1xf32>,
    %c0_42 = arith.constant 0 : index
    %c0_43 = arith.constant 0 : index
    %81 = vector.load %arg12[%c0_42, %c0_43] : memref<1x1xf32, #tpu.memory_space<vmem>>, vector<1x1xf32>
    %82 = vector.shape_cast %54 : vector<1x256xf32> to vector<1x1x256xf32>
    %cst_44 = arith.constant dense<0.000000e+00> : vector<1xf32>
    %83 = vector.multi_reduction <add>, %82, %cst_44 [1, 2] : vector<1x1x256xf32> to vector<1xf32>
    %84 = vector.shape_cast %83 : vector<1xf32> to vector<1x1x1xf32>
    %85 = vector.extract %84[0, 0, 0] : f32 from vector<1x1x1xf32>
    %86 = vector.broadcast %85 : f32 to vector<1x1xf32>
    %87 = arith.addf %81, %86 : vector<1x1xf32>
    %c0_45 = arith.constant 0 : index
    %c0_46 = arith.constant 0 : index
    %88 = vector.load %arg12[%c0_45, %c0_46] : memref<1x1xf32, #tpu.memory_space<vmem>>, vector<1x1xf32>
    tpu.vector_store %arg12[%c0_45, %c0_46], %87 {strides = array<i32>} : memref<1x1xf32, #tpu.memory_space<vmem>>, vector<1x1xf32>,
    %c0_i32_47 = arith.constant 0 : i32
    %89 = arith.cmpi eq, %arg1, %c0_i32_47 : i32
    %90 = arith.extui %89 : i1 to i32
    %c0_i32_48 = arith.constant 0 : i32
    %91 = arith.cmpi ne, %90, %c0_i32_48 : i32
    scf.if %91 {
      %c0_49 = arith.constant 0 : index
      %c0_50 = arith.constant 0 : index
      %92 = vector.load %arg6[%c0_49, %c0_50] : memref<4x1xf32, #tpu.memory_space<vmem>>, vector<4x1xf32>
      %c0_51 = arith.constant 0 : index
      %c0_52 = arith.constant 0 : index
      %c0_53 = arith.constant 0 : index
      %93 = vector.load %arg4[%c0_51, %c0_52, %c0_53] : memref<1x4x3xf32, #tpu.memory_space<vmem>>, vector<1x4x1xf32>
      %94 = vector.shape_cast %93 : vector<1x4x1xf32> to vector<4x1xf32>
      %95 = vector.shape_cast %92 : vector<4x1xf32> to vector<1x4x1xf32>
      tpu.vector_store %arg4[%c0_51, %c0_52, %c0_53], %95 {strides = array<i32>} : memref<1x4x3xf32, #tpu.memory_space<vmem>>, vector<1x4x1xf32>,
      %c0_54 = arith.constant 0 : index
      %c0_55 = arith.constant 0 : index
      %96 = vector.load %arg7[%c0_54, %c0_55] : memref<4x1xf32, #tpu.memory_space<vmem>>, vector<4x1xf32>
      %c0_56 = arith.constant 0 : index
      %c0_57 = arith.constant 0 : index
      %c1 = arith.constant 1 : index
      %97 = vector.load %arg4[%c0_56, %c0_57, %c1] : memref<1x4x3xf32, #tpu.memory_space<vmem>>, vector<1x4x1xf32>
      %98 = vector.shape_cast %97 : vector<1x4x1xf32> to vector<4x1xf32>
      %99 = vector.shape_cast %96 : vector<4x1xf32> to vector<1x4x1xf32>
      tpu.vector_store %arg4[%c0_56, %c0_57, %c1], %99 {strides = array<i32>} : memref<1x4x3xf32, #tpu.memory_space<vmem>>, vector<1x4x1xf32>,
      %c0_58 = arith.constant 0 : index
      %c0_59 = arith.constant 0 : index
      %100 = vector.load %arg8[%c0_58, %c0_59] : memref<4x1xf32, #tpu.memory_space<vmem>>, vector<4x1xf32>
      %c0_60 = arith.constant 0 : index
      %c0_61 = arith.constant 0 : index
      %c2 = arith.constant 2 : index
      %101 = vector.load %arg4[%c0_60, %c0_61, %c2] : memref<1x4x3xf32, #tpu.memory_space<vmem>>, vector<1x4x1xf32>
      %102 = vector.shape_cast %101 : vector<1x4x1xf32> to vector<4x1xf32>
      %103 = vector.shape_cast %100 : vector<4x1xf32> to vector<1x4x1xf32>
      tpu.vector_store %arg4[%c0_60, %c0_61, %c2], %103 {strides = array<i32>} : memref<1x4x3xf32, #tpu.memory_space<vmem>>, vector<1x4x1xf32>,
      %c0_62 = arith.constant 0 : index
      %c0_63 = arith.constant 0 : index
      %104 = vector.load %arg9[%c0_62, %c0_63] : memref<1x1xf32, #tpu.memory_space<vmem>>, vector<1x1xf32>
      %c0_64 = arith.constant 0 : index
      %c0_65 = arith.constant 0 : index
      %c0_66 = arith.constant 0 : index
      %105 = vector.load %arg5[%c0_64, %c0_65, %c0_66] : memref<1x1x4xf32, #tpu.memory_space<vmem>>, vector<1x1x1xf32>
      %106 = vector.shape_cast %105 : vector<1x1x1xf32> to vector<1x1xf32>
      %107 = vector.shape_cast %104 : vector<1x1xf32> to vector<1x1x1xf32>
      tpu.vector_store %arg5[%c0_64, %c0_65, %c0_66], %107 {strides = array<i32>} : memref<1x1x4xf32, #tpu.memory_space<vmem>>, vector<1x1x1xf32>,
      %c0_67 = arith.constant 0 : index
      %c0_68 = arith.constant 0 : index
      %108 = vector.load %arg10[%c0_67, %c0_68] : memref<1x1xf32, #tpu.memory_space<vmem>>, vector<1x1xf32>
      %c0_69 = arith.constant 0 : index
      %c0_70 = arith.constant 0 : index
      %c1_71 = arith.constant 1 : index
      %109 = vector.load %arg5[%c0_69, %c0_70, %c1_71] : memref<1x1x4xf32, #tpu.memory_space<vmem>>, vector<1x1x1xf32>
      %110 = vector.shape_cast %109 : vector<1x1x1xf32> to vector<1x1xf32>
      %111 = vector.shape_cast %108 : vector<1x1xf32> to vector<1x1x1xf32>
      tpu.vector_store %arg5[%c0_69, %c0_70, %c1_71], %111 {strides = array<i32>} : memref<1x1x4xf32, #tpu.memory_space<vmem>>, vector<1x1x1xf32>,
      %c0_72 = arith.constant 0 : index
      %c0_73 = arith.constant 0 : index
      %112 = vector.load %arg11[%c0_72, %c0_73] : memref<1x1xf32, #tpu.memory_space<vmem>>, vector<1x1xf32>
      %c0_74 = arith.constant 0 : index
      %c0_75 = arith.constant 0 : index
      %c2_76 = arith.constant 2 : index
      %113 = vector.load %arg5[%c0_74, %c0_75, %c2_76] : memref<1x1x4xf32, #tpu.memory_space<vmem>>, vector<1x1x1xf32>
      %114 = vector.shape_cast %113 : vector<1x1x1xf32> to vector<1x1xf32>
      %115 = vector.shape_cast %112 : vector<1x1xf32> to vector<1x1x1xf32>
      tpu.vector_store %arg5[%c0_74, %c0_75, %c2_76], %115 {strides = array<i32>} : memref<1x1x4xf32, #tpu.memory_space<vmem>>, vector<1x1x1xf32>,
      %c0_77 = arith.constant 0 : index
      %c0_78 = arith.constant 0 : index
      %116 = vector.load %arg12[%c0_77, %c0_78] : memref<1x1xf32, #tpu.memory_space<vmem>>, vector<1x1xf32>
      %c0_79 = arith.constant 0 : index
      %c0_80 = arith.constant 0 : index
      %c3 = arith.constant 3 : index
      %117 = vector.load %arg5[%c0_79, %c0_80, %c3] : memref<1x1x4xf32, #tpu.memory_space<vmem>>, vector<1x1x1xf32>
      %118 = vector.shape_cast %117 : vector<1x1x1xf32> to vector<1x1xf32>
      %119 = vector.shape_cast %116 : vector<1x1xf32> to vector<1x1x1xf32>
      tpu.vector_store %arg5[%c0_79, %c0_80, %c3], %119 {strides = array<i32>} : memref<1x1x4xf32, #tpu.memory_space<vmem>>, vector<1x1x1xf32>,
    } else {
    }
    return
  }
  func.func @transform_0(%arg0: i32, %arg1: i32) -> (i32, i32, i32) {
    %c0_i32 = arith.constant 0 : i32
    %c0_i32_0 = arith.constant 0 : i32
    return %arg0, %c0_i32, %arg1 : i32, i32, i32
  }
  func.func @transform_1(%arg0: i32, %arg1: i32) -> (i32, i32, i32) {
    %c0_i32 = arith.constant 0 : i32
    %c0_i32_0 = arith.constant 0 : i32
    return %arg0, %c0_i32, %arg1 : i32, i32, i32
  }
  func.func @transform_2(%arg0: i32, %arg1: i32) -> (i32, i32, i32) {
    %c0_i32 = arith.constant 0 : i32
    %c0_i32_0 = arith.constant 0 : i32
    %c0_i32_1 = arith.constant 0 : i32
    return %arg0, %c0_i32, %c0_i32_0 : i32, i32, i32
  }
  func.func @transform_3(%arg0: i32, %arg1: i32) -> (i32, i32, i32) {
    %c0_i32 = arith.constant 0 : i32
    %c0_i32_0 = arith.constant 0 : i32
    %c0_i32_1 = arith.constant 0 : i32
    return %arg0, %c0_i32, %c0_i32_0 : i32, i32, i32
  }
}

</mosaic_0001>

<bundles_post_ra>
// kernel: dc_and_ce_loss_masked.1
= control target key start
LH: loop header
LB: loop body
LE: loop exit
PB: predicated region body
PF: predicated region fallthrough
CT: control target
= control target key end

     0   :  { %s742_s12 = smov 0   ;;  %s744_s13 = smov 0   ;;  %s879_s0 = inlined_call_operand.vmem [shape: f32[2,4,256], index: 0, kind: input, shape index: {}]   ;;  %s880_s1 = inlined_call_operand.vmem [shape: s32[2,1,256], index: 1, kind: input, shape index: {}]   ;;  %s881_s2 = inlined_call_operand.vmem [shape: f32[2,4,3], index: 2, kind: output, shape index: {0}]   ;;  %s882_s3 = inlined_call_operand.vmem [shape: f32[2,1,4], index: 3, kind: output, shape index: {1}]  }
   0x1   :  { %s746_s14 = smov 0  }
   0x2 LB: > { %s26_s15 = sadd.s32 1, %s712_s13  ;;  %p634_p0 = scmp.ge.s32.totalorder %s716_s14, 1  ;;  %s716_s14 = sphi %s746_s14, %s14_s14   ;;  %s712_s13 = sphi %s744_s13, %s888_s13   ;;  %s708_s12 = sphi %s742_s12, %s887_s12  }
   0x3   : > { %p28_p1 = scmp.ge.s32.totalorder %s26_s15, 2  ;;  %p175_p2 = scmp.lt.s32.totalorder %s716_s14, 3 }
   0x5   : > { %s890_s15 = smov (%p28_p1, %s26_s15), 0  ;;  %p176_p3 = pnand %p634_p0, %p175_p2 }
   0x6   : > { %p214_p4 = scmp.lt.s32.totalorder (!%p176_p3), %s708_s12, 1  ;;  %s719_s24 = smov (!%p176_p3), 2  }
   0x7   : > { %179 = sbr.rel (%p176_p3) target bundleno = 430 (0x1ae), region = 28  ;;  %s720_s25 = smov (!%p176_p3), 1  }
   0x8   : > { %s721_s10 = smov (!%p176_p3), 3  }
   0xc   : > { %v307_v0 = vlaneseq  ;;  %s892_s12 = smov (!%p214_p4, %s708_s12), 1  ;;  %vm257_vm0 = vcmask 1043456   ;;  %v718_v11 = vmov 0.0   ;;  %vm391_vm3 = vcmask 1040384  }
   0xd   : > { %s646_s16 = sshll.u32 %s892_s12, 3  ;;  %s637_s17 = sshll.u32 %s892_s12, 1  ;;  %vm247_vm6 = vcmask 0   ;;  %vm243_vm7 = vcmask 3072   ;;  %vm479_vm8 = vcmask 11272   ;;  %vm486_vm9 = vcmask 19472  }
   0xe   : > { %v308_v1 = vshrl.u32 %v307_v0, 7  ;;  %s221_s20 = scalar_lea.vmem %s879_s0, %s646_s16  ;;  %s230_s23 = scalar_lea.vmem %s880_s1, %s637_s17  ;;  %248 = vst.msk [vmem:[#allocation5] sm:$0x1] %vm247_vm6, %v718_v11  ;;  %249 = vst.msk [vmem:[#allocation6] sm:$0x1] %vm247_vm6, %v718_v11  ;;  %vm499_vm10 = vcmask 8200  }
   0xf   : > { %v252_v3 = vld [vmem:[%s221_s20] sm:$0xff]  ;;  %250 = vst.msk [vmem:[#allocation7] sm:$0x1] %vm247_vm6, %v718_v11  ;;  %251 = vst.msk [vmem:[#allocation8] sm:$0x1] %vm247_vm6, %v718_v11  ;;  %s638_s26 = sshll.u32 %s892_s12, 2  ;;  %s238_s9 = scalar_lea.vmem %s882_s3, %s892_s12 }
  0x10   : > { %v311_v2 = vsub.s32 0, %v308_v1  ;;  %v253_v4 = vld [vmem:[%s230_s23] sm:$0x3]  ;;  %v315_v5 = vsub.s32 1, %v308_v1  ;;  %v255_v6 = vcombine.high %v252_v3, %v252_v3  ;;  %v258_v7 = vsel %vm257_vm0, %v252_v3, -inf  ;;  %s853_s29 = scalar_lea.vmem %s881_s2, %s638_s26 }
  0x11   : > { %v259_v8 = vrot.slane %v258_v7, 4  ;;  %vm371_vm1 = vcmp.ne.s32.totalorder %v253_v4, 1  ;;  %vm372_vm2 = vcmp.ne.s32.totalorder %v253_v4, 2  ;;  %245 = vst.msk [vmem:[#allocation3] sm:$0xf] %vm243_vm7, %v718_v11  ;;  %vm510_vm11 = vcmask 16400  }
  0x12   : > { %v265_v9 = vsel %vm257_vm0, %v255_v6, -inf  ;;  %v312_v10 = vrot.slane %v253_v4, %v311_v2  ;;  %v639_v12 = vsel %vm371_vm1, 1.0, %v718_v11  ;;  %v316_v15 = vrot.slane %v253_v4, %v315_v5  ;;  %244 = vst.msk [vmem:[#allocation2] sm:$0xf] %vm243_vm7, %v718_v11  ;;  %246 = vst.msk [vmem:[#allocation4] sm:$0xf] %vm243_vm7, %v718_v11 }
  0x13   : > { %v260_v13 = vmax.f32 %v258_v7, %v259_v8  ;;  %v266_v14 = vrot.slane %v265_v9, 4  ;;  %v773_v16 = vrot.slane %v639_v12, %v311_v2  ;;  %v775_v17 = vrot.slane %v639_v12, %v315_v5 }
  0x14   : > { %vm777_vm4 = vcmp.eq.s32.totalorder %v308_v1, %v312_v10  ;;  %v640_v23 = vsel %vm372_vm2, 1.0, %v718_v11  ;;  %vm786_vm5 = vcmp.eq.s32.totalorder %v308_v1, %v316_v15  ;;  %vm521_vm12 = vcmask 24600  }
  0x15   : > { %v261_v18 = vrot.slane %v260_v13, 2  ;;  %v267_v19 = vmax.f32 %v265_v9, %v266_v14  ;;  %v438_v21 = vsel %vm391_vm3, %v773_v16, 0.0  ;;  %v439_v22 = vsel %vm391_vm3, %v775_v17, 0.0 }
  0x16   : > { %v342_v27 = vsel %vm777_vm4, 1.0, %v718_v11  ;;  %v440_v28 = vadd.f32 %v439_v22, %v438_v21  ;;  %v793_v29 = vrot.slane %v640_v23, %v311_v2  ;;  %v795_v30 = vrot.slane %v640_v23, %v315_v5 }
  0x17   : > { %v262_v24 = vmax.f32 %v260_v13, %v261_v18  ;;  %v268_v25 = vrot.slane %v267_v19, 2  ;;  %v343_v31 = vsel %vm786_vm5, 1.0, %v718_v11  ;;  %v344_v38 = vsel %vm257_vm0, %v342_v27, 0.0 }
  0x18   : > { %441 = vadd.xlane.f32.xlu1 %v440_v28  ;;  %v454_v34 = vsel %vm391_vm3, %v793_v29, 0.0  ;;  %v455_v35 = vsel %vm391_vm3, %v795_v30, 0.0  ;;  %v345_v39 = vsel %vm257_vm0, %v343_v31, 0.0  ;;  %v351_v51 = vsel %vm777_vm4, %v252_v3, 0.0 }
  0x19   : > { %v263_v32 = vrot.slane %v262_v24, 1  ;;  %v269_v33 = vmax.f32 %v267_v19, %v268_v25  ;;  %v456_v40 = vadd.f32 %v455_v35, %v454_v34  ;;  %v346_v42 = vadd.f32 %v345_v39, %v344_v38 }
  0x1a   : > { %v352_v54 = vsel %vm786_vm5, %v255_v6, 0.0  ;;  %v353_v57 = vsel %vm257_vm0, %v351_v51, 0.0 }
  0x1b   : > { %v264_v36 = vmax.f32 %v262_v24, %v263_v32  ;;  %v270_v37 = vrot.slane %v269_v33, 1  ;;  %v360_v58 = vsel %vm257_vm0, %v352_v54, 0.0  ;;  %v354_v61 = vrot.slane %v353_v57, 4 }
  0x1c   : > { %457 = vadd.xlane.f32.xlu1 %v456_v40  ;;  %v361_v0 = vrot.slane %v360_v58, 4 }
  0x1d   : > { %v271_v41 = vmax.f32 %v269_v33, %v270_v37 }
  0x1e   : > { %v362_v5 = vadd.f32 %v361_v0, %v360_v58 }
  0x1f   : > { %v274_v43 = vcombine.low %v264_v36, %v271_v41 }
  0x20   : > { %347 = vadd.xlane.f32.xlu1 %v346_v42  ;;  %v363_v7 = vrot.slane %v362_v5, 2 }
  0x21   : > { %v276_v44 = vsub.f32 %v252_v3, %v274_v43  ;;  %v355_v3 = vadd.f32 %v354_v61, %v353_v57 }
  0x22   : > { %v364_v9 = vadd.f32 %v363_v7, %v362_v5 }
  0x23   : > { %v277_v45 = vmul.f32 1.442695, %v276_v44  ;;  %v356_v6 = vrot.slane %v355_v3, 2 }
  0x24   : > { %v365_v12 = vrot.slane %v364_v9, 1 }
  0x25   : > { %684 = vpow2.f32 %v277_v45  ;;  %v357_v8 = vadd.f32 %v356_v6, %v355_v3 }
  0x26   : > { %v366_v23 = vadd.f32 %v365_v12, %v364_v9 }
  0x27   : > { %v358_v10 = vrot.slane %v357_v8, 1 }
  0x29   : > { %v359_v19 = vadd.f32 %v358_v10, %v357_v8 }
  0x32   : > { %v685_v46 = vpop.eup %684 }
  0x33   : > { %v280_v47 = vcombine.high %v685_v46, %v685_v46  ;;  %v282_v48 = vsel %vm257_vm0, %v685_v46, 0.0 }
  0x34   : > { %v283_v49 = vrot.slane %v282_v48, 4 }
  0x35   : > { %v289_v50 = vsel %vm257_vm0, %v280_v47, 0.0 }
  0x36   : > { %v284_v52 = vadd.f32 %v283_v49, %v282_v48  ;;  %v290_v53 = vrot.slane %v289_v50, 4  ;;  %v341_v48 = vld [vmem:[#allocation4] sm:$0xf] }
  0x38   : > { %v285_v55 = vrot.slane %v284_v52, 2  ;;  %v291_v56 = vadd.f32 %v290_v53, %v289_v50 }
  0x3a   : > { %v286_v59 = vadd.f32 %v285_v55, %v284_v52  ;;  %v292_v60 = vrot.slane %v291_v56, 2 }
  0x3c   : > { %v287_v62 = vrot.slane %v286_v59, 1  ;;  %v293_v63 = vadd.f32 %v292_v60, %v291_v56 }
  0x3e   : > { %v288_v1 = vadd.f32 %v287_v62, %v286_v59  ;;  %v294_v2 = vrot.slane %v293_v63, 1 }
  0x40   : > { %v295_v4 = vadd.f32 %v294_v2, %v293_v63  ;;  %686 = vrcp.f32 %v288_v1  ;;  %v333_v63 = vld [vmem:[#allocation3] sm:$0xf] }
  0x41   : > { %688 = vlog2.f32 %v288_v1 }
  0x42   : > { %690 = vlog2.f32 %v295_v4 }
  0x43   : > { %692 = vrcp.f32 %v295_v4 }
  0x4d   : > { %v687_v13 = vpop.eup %686 }
  0x4e   : > { %v689_v14 = vpop.eup %688 }
  0x4f   : > { %v691_v15 = vpop.eup %690  ;;  %v304_v18 = vmul.f32 0.6931472, %v689_v14 }
  0x50   : > { %v693_v21 = vpop.eup %692  ;;  %v306_v22 = vmul.f32 0.6931472, %v691_v15 }
  0x51   : > { %v367_v24 = vadd.f32 %v304_v18, %v264_v36  ;;  %v300_v25 = vcombine.low %v687_v13, %v693_v21  ;;  %v319_v21 = vld [vmem:[#allocation2] sm:$0xf] }
  0x52   : > { %v368_v27 = vadd.f32 %v306_v22, %v271_v41 }
  0x53   : > { %v369_v28 = vsub.f32 %v367_v24, %v359_v19  ;;  %v302_v32 = vmul.f32 %v685_v46, %v300_v25  ;;  %v377_v25 = vld [vmem:[#allocation5] sm:$0x1] }
  0x54   : > { %v370_v31 = vsub.f32 %v368_v27, %v366_v23 }
  0x55   : > { %v389_v33 = vmul.f32 %v773_v16, %v369_v28  ;;  %v420_v34 = vmul.f32 %v793_v29, %v369_v28  ;;  %v321_v41 = vcombine.high %v302_v32, %v302_v32  ;;  %v334_v16 = vsel %vm257_vm0, %v302_v32, 0.0 }
  0x56   : > { %v390_v35 = vmul.f32 %v775_v17, %v370_v31  ;;  %v421_v37 = vmul.f32 %v795_v30, %v370_v31  ;;  %v323_v30 = vsel %vm777_vm4, %v302_v32, 0.0  ;;  %v408_v31 = vld [vmem:[#allocation6] sm:$0x1]  ;;  %v437_v32 = vld [vmem:[#allocation7] sm:$0x1] }
  0x57   : > { %v392_v38 = vsel %vm391_vm3, %v389_v33, 0.0  ;;  %v422_v39 = vsel %vm391_vm3, %v420_v34, 0.0  ;;  %v335_v29 = vsel %vm257_vm0, %v321_v41, 0.0  ;;  %v324_v44 = vsel %vm786_vm5, %v321_v41, 0.0  ;;  %v453_v34 = vld [vmem:[#allocation8] sm:$0x1] }
  0x58   : > { %v393_v40 = vsel %vm391_vm3, %v390_v35, 0.0  ;;  %v423_v36 = vsel %vm391_vm3, %v421_v37, 0.0  ;;  %v336_v17 = vadd.f32 %v335_v29, %v334_v16  ;;  %v325_v45 = vsel %vm257_vm0, %v323_v30, 0.0 }
  0x59   : > { %v394_v42 = vadd.f32 %v393_v40, %v392_v38  ;;  %v424_v43 = vadd.f32 %v423_v36, %v422_v39  ;;  %v326_v46 = vsel %vm257_vm0, %v324_v44, 0.0 }
  0x5a   : > { %v327_v20 = vadd.f32 %v326_v46, %v325_v45 }
  0x5b   : > { %395 = vadd.xlane.f32.xlu0 %v394_v42 }
  0x5f   : > { %425 = vadd.xlane.f32.xlu0 %v424_v43 }
  0x63   : > { %337 = vadd.xlane.f32.xlu0 %v336_v17 }
  0x67   : > { %328 = vadd.xlane.f32.xlu0 %v327_v20 }
  0xa1   : > { %v442_v26 = vpop.xlane.xlu1 %441 }
  0xa2   : > { %v443_v53 = vrot.slane %v442_v26, 4 }
  0xa4   : > { %v444_v56 = vadd.f32 %v443_v53, %v442_v26 }
  0xa5   : > { %v458_v47 = vpop.xlane.xlu1 %457 }
  0xa6   : > { %v459_v52 = vrot.slane %v458_v47, 4  ;;  %v445_v11 = vrot.slane %v444_v56, 2 }
  0xa8   : > { %v460_v54 = vadd.f32 %v459_v52, %v458_v47  ;;  %v446_v3 = vadd.f32 %v445_v11, %v444_v56 }
  0xa9   : > { %v348_v49 = vpop.xlane.xlu1 %347 }
  0xaa   : > { %v349_v50 = vadd.f32 %v348_v49, %v341_v48  ;;  %v461_v59 = vrot.slane %v460_v54, 2  ;;  %v447_v12 = vrot.slane %v446_v3, 1 }
  0xac   : > { %350 = vst.msk [vmem:[#allocation4] sm:$0xf] %vm243_vm7, %v349_v50  ;;  %v462_v2 = vadd.f32 %v461_v59, %v460_v54  ;;  %v448_v18 = vadd.f32 %v447_v12, %v446_v3 }
  0xae   : > { %v463_v10 = vrot.slane %v462_v2, 1 }
  0xb0   : > { %v464_v15 = vadd.f32 %v463_v10, %v462_v2 }
  0xb3   : > { %v481_v51 = vld [vmem:[#allocation4] sm:$0xf] }
  0xb4   : > { %483 = vrot.lane.b32.xlu1 %v481_v51, %s719_s24 }
  0xe4   : > { %v396_v55 = vpop.xlane.xlu0 %395 }
  0xe5   : > { %v397_v57 = vrot.slane %v396_v55, 4 }
  0xe7   : > { %v398_v58 = vadd.f32 %v397_v57, %v396_v55 }
  0xe8   : > { %v426_v60 = vpop.xlane.xlu0 %425 }
  0xe9   : > { %v399_v61 = vrot.slane %v398_v58, 2  ;;  %v427_v62 = vrot.slane %v426_v60, 4 }
  0xeb   : > { %v428_v0 = vadd.f32 %v427_v62, %v426_v60  ;;  %v400_v1 = vadd.f32 %v399_v61, %v398_v58 }
  0xec   : > { %v338_v4 = vpop.xlane.xlu0 %337 }
  0xed   : > { %v429_v5 = vrot.slane %v428_v0, 2  ;;  %v401_v6 = vrot.slane %v400_v1, 1  ;;  %v339_v7 = vadd.f32 %v338_v4, %v333_v63 }
  0xef   : > { %v402_v8 = vadd.f32 %v401_v6, %v400_v1  ;;  %v430_v9 = vadd.f32 %v429_v5, %v428_v0  ;;  %340 = vst.msk [vmem:[#allocation3] sm:$0xf] %vm243_vm7, %v339_v7 }
  0xf0   : > { %v329_v22 = vpop.xlane.xlu0 %328 }
  0xf1   : > { %647 = vpush %v402_v8  ;;  %v431_v13 = vrot.slane %v430_v9, 1  ;;  %v330_v23 = vadd.f32 %v329_v22, %v319_v21 }
  0xf3   : > { %v432_v14 = vadd.f32 %v431_v13, %v430_v9  ;;  %332 = vst.msk [vmem:[#allocation2] sm:$0xf] %vm243_vm7, %v330_v23 }
  0xf5   : > { %649 = vpush %v432_v14 }
  0xf6   : > { %651 = vpush %v448_v18  ;;  %v474_v19 = vld [vmem:[#allocation3] sm:$0xf] }
  0xf7   : > { %653 = vpush %v464_v15  ;;  %476 = vrot.lane.b32.xlu0 %v474_v19, %s720_s25 }
  0xfa   : > { %v472_v24 = vld [vmem:[#allocation2] sm:$0xf] }
  0xfb   : > { %473 = vst.msk [vmem:[%s853_s29] sm:$0xf] %vm243_vm7, %v472_v24 }
 0x122   : > { %s648_s30 = spop %647 }
 0x123   : > { %v404_v27 = vstv %s648_s30 }
 0x124   : > { %v405_v28 = vadd.f32 %v404_v27, %v377_v25 }
 0x126   : > { %407 = vst.msk [vmem:[#allocation5] sm:$0x1] %vm247_vm6, %v405_v28  ;;  %s650_s4 = spop %649  ;;  %v484_v16 = vpop.permute.xlu1 %483 }
 0x127   : > { %v434_v33 = vstv %s650_s4  ;;  %s652_s5 = spop %651 }
 0x128   : > { %v435_v35 = vadd.f32 %v434_v33, %v408_v31  ;;  %v450_v37 = vstv %s652_s5  ;;  %s654_s6 = spop %653 }
 0x129   : > { %v451_v38 = vadd.f32 %v450_v37, %v437_v32  ;;  %v466_v39 = vstv %s654_s6 }
 0x12a   : > { %436 = vst.msk [vmem:[#allocation6] sm:$0x1] %vm247_vm6, %v435_v35  ;;  %v467_v40 = vadd.f32 %v466_v39, %v453_v34 }
 0x12b   : > { %452 = vst.msk [vmem:[#allocation7] sm:$0x1] %vm247_vm6, %v451_v38 }
 0x12c   : > { %468 = vst.msk [vmem:[#allocation8] sm:$0x1] %vm247_vm6, %v467_v40 }
 0x12d   : > { %v488_v36 = vld [vmem:[#allocation5] sm:$0x1] }
 0x12e   : > { %489 = vst.msk [vmem:[%s238_s9] sm:$0x1] %vm247_vm6, %v488_v36 }
 0x131   : > { %v641_v41 = vld [vmem:[#allocation6] ss:$0 sm:$0xff] }
 0x132   : > { %496 = vrot.lane.b32.xlu1 %v641_v41, %s720_s25  ;;  %v642_v42 = vld [vmem:[#allocation7] ss:$0 sm:$0xff] }
 0x133   : > { %v643_v43 = vld [vmem:[#allocation8] ss:$0 sm:$0xff] }
 0x136   : > { %507 = vrot.lane.b32.xlu1 %v642_v42, %s719_s24 }
 0x13a   : > { %518 = vrot.lane.b32.xlu1 %v643_v43, %s721_s10 }
 0x169   : > { %v477_v29 = vpop.permute.xlu0 %476 }
 0x16a   : > { %480 = vst.msk [vmem:[%s853_s29] sm:$0xf] %vm479_vm8, %v477_v29 }
 0x16b   : > { %487 = vst.msk [vmem:[%s853_s29] sm:$0xf] %vm486_vm9, %v484_v16 }
 0x1a4   : > { %v497_v17 = vpop.permute.xlu1 %496 }
 0x1a5   : > { %500 = vst.msk [vmem:[%s238_s9] sm:$0x1] %vm499_vm10, %v497_v17 }
 0x1a8   : > { %v508_v30 = vpop.permute.xlu1 %507 }
 0x1a9   : > { %511 = vst.msk [vmem:[%s238_s9] sm:$0x1] %vm510_vm11, %v508_v30 }
 0x1ac   : > { %v519_v44 = vpop.permute.xlu1 %518 }
 0x1ad   : > { %522 = vst.msk [vmem:[%s238_s9] sm:$0x1] %vm521_vm12, %v519_v44 }
 0x1ae PF: > { %s14_s14 = sadd.s32 1, %s716_s14   ;;  %s887_s12 = smov %s712_s13 }
 0x1af   : > { %p11_p5 = scmp.ge.s32.totalorder %s14_s14, 4   ;;  %s888_s13 = smov %s890_s15 }
 0x1b1   :  { %13 = sbr.rel (!%p11_p5) target bundleno = 2 (0x2), region = 81 }

</bundles_post_ra>
